<compile_context>
chip_gen: v5e
topology: v5e:2x2
jax: 0.10.0
libtpu: 0.0.40
codegen_flags: <defaults>
</compile_context>

<pallas_src>
import math

import numpy as np
import jax
import jax.numpy as jnp
from jax.experimental import pallas as pl
from jax.experimental.pallas import tpu as pltpu

SQRT2 = math.sqrt(2.0)


# --------------------------------------------------------------------------
# Shared index arithmetic (used by both kernels and the pure-JAX reference so
# that the float ops are bit-identical).
# --------------------------------------------------------------------------
def _nearest_detector_index(sin_t, cos_t, ii, jj, g):
    """ii/jj: float image row/col coords. Returns (iy_n, valid) with iy_n the
    nearest detector (height) index and valid the in-bounds mask."""
    gf = jnp.float32(g)
    x_c = (2.0 * jj + 1.0) / gf - 1.0          # varies along W (j)
    y_c = (2.0 * ii + 1.0) / gf - 1.0          # varies along H (i)
    # R = [[sin, cos, 0], [cos, -sin, 0]]  (affine_grid), align_corners=False
    gx = sin_t * x_c + cos_t * y_c
    gy = cos_t * x_c - sin_t * y_c
    ix = ((gx + 1.0) * gf - 1.0) * 0.5
    iy = ((gy + 1.0) * gf - 1.0) * 0.5
    ix_n = jnp.floor(ix + 0.5).astype(jnp.int32)   # nearest (see TODO on ties)
    iy_n = jnp.floor(iy + 0.5).astype(jnp.int32)
    valid = (ix_n >= 0) & (ix_n < g) & (iy_n >= 0) & (iy_n < g)
    return iy_n, valid


def _make_trig(theta_deg):
    """(T, 1, 2) float32 with [sin(theta), cos(theta)] per angle."""
    t = jnp.deg2rad(jnp.asarray(theta_deg).astype(jnp.float32))
    return jnp.stack([jnp.sin(t), jnp.cos(t)], axis=-1)[:, None, :]


def _vmem_limit_bytes():
    """<= 3/4 of physical VMEM, capped at 64 MiB (review: leave headroom on v7x)."""
    try:
        cap = int(getattr(pltpu.get_tpu_info(), "vmem_capacity_bytes", 0))
    except Exception:
        cap = 0
    if cap <= 0:
        return 48 * 1024 * 1024   # conservative default, fits v7x's 64 MiB/TC
    return min(3 * cap // 4, 64 * 1024 * 1024)


def _compiler_params():
    return pltpu.CompilerParams(
        dimension_semantics=("parallel", "parallel"),
        vmem_limit_bytes=_vmem_limit_bytes())


# --------------------------------------------------------------------------
# Primary kernel: in-VMEM lane gather, output written directly as (B, T, G, G)
# --------------------------------------------------------------------------
def _stackgram_gather_kernel(trig_ref, proj_ref, out_ref):
    # trig_ref : (1, 1, 2)    [sin, cos] for this angle
    # proj_ref : (1, B, G)    projection line (all batches); its index_map ignores
    #                         the row-tile axis so it is DMA'd once per angle
    # out_ref  : (B, 1, TR, G) output rows [ri*TR, (ri+1)*TR) of the linogram
    nb = out_ref.shape[0]
    tr, g = out_ref.shape[2], out_ref.shape[3]
    sin_t = trig_ref[0, :, 0:1]                                   # (1, 1)
    cos_t = trig_ref[0, :, 1:2]                                   # (1, 1)
    r0 = (pl.program_id(1) * tr).astype(jnp.float32)
    jj = jax.lax.broadcasted_iota(jnp.int32, (tr, g), 1).astype(jnp.float32)
    ii = jax.lax.broadcasted_iota(jnp.int32, (tr, g), 0).astype(jnp.float32) + r0
    iy_n, valid = _nearest_detector_index(sin_t, cos_t, ii, jj, g)
    iy_c = jnp.clip(iy_n, 0, g - 1)                               # (TR, G) int32
    for bi in range(nb):                                          # B is tiny
        line = proj_ref[0, bi:bi + 1, :]                          # (1, G)
        vals = jnp.broadcast_to(line, (tr, g))
        sampled = jnp.take_along_axis(
            vals, iy_c, axis=-1,
            mode=jax.lax.GatherScatterMode.PROMISE_IN_BOUNDS)
        out_ref[bi, 0] = jnp.where(valid, sampled, 0.0)


def _pick_rows_per_tile(g, b, budget_bytes=24 * 1024 * 1024):
    """Largest row tile (whole image if possible) under a rough VMEM budget."""
    def cost(tr):
        return 4 * tr * g * (2 * b + 8)     # out (double-buffered) + intermediates
    if g % 8 != 0 or cost(g) <= budget_bytes:
        return g
    best = 8
    for tr in range(8, g, 8):
        if g % tr == 0 and cost(tr) <= budget_bytes:
            best = tr
    return best


def _stackgram_gather(proj, trig, b, g, n_ang, rows_per_tile, cparams):
    tr = int(rows_per_tile) if rows_per_tile is not None else _pick_rows_per_tile(g, b)
    assert g % tr == 0 and (tr % 8 == 0 or tr == g), "bad rows_per_tile"
    n_row_tiles = g // tr
    return pl.pallas_call(
        _stackgram_gather_kernel,
        out_shape=jax.ShapeDtypeStruct((b, n_ang, g, g), jnp.float32),
        grid=(n_ang, n_row_tiles),                        # row tiles innermost
        in_specs=[
            pl.BlockSpec((1, 1, 2), lambda ti, ri: (ti, 0, 0)),
            pl.BlockSpec((1, b, g), lambda ti, ri: (ti, 0, 0)),
        ],
        out_specs=pl.BlockSpec((b, 1, tr, g), lambda ti, ri: (0, ti, ri, 0)),
        compiler_params=cparams,
    )(trig, proj)


# --------------------------------------------------------------------------
# Fallback kernel: one-hot gather on the MXU over flat pixel tiles (guaranteed
# lowering); indices are still computed in-kernel (no HBM index stream).
# --------------------------------------------------------------------------
def _stackgram_onehot_kernel(trig_ref, proj_ref, out_ref):
    # trig_ref: (1,1,2); proj_ref: (1,B,G); out_ref: (1,B,TN) flat pixel tile
    _, _, tn = out_ref.shape
    g = proj_ref.shape[2]
    gf = jnp.float32(g)
    sin_t = trig_ref[0, :, 0:1]
    cos_t = trig_ref[0, :, 1:2]
    p0 = pl.program_id(1) * tn
    pix = (jax.lax.broadcasted_iota(jnp.int32, (1, tn), 1) + p0).astype(jnp.float32)
    # flat pixel -> (row, col); exact in f32 for g <= 2048 (frac part >= 1/g > half-ulp)
    ii = jnp.floor(pix / gf)
    jj = pix - ii * gf
    iy_n, valid = _nearest_detector_index(sin_t, cos_t, ii, jj, g)
    idx = jnp.where(valid, iy_n, -1)                        # -1 sentinel: row all-zero
    h = jax.lax.broadcasted_iota(jnp.int32, (g, tn), 0)
    # sel stays f32: bf16 would require a bf16 projection operand and break the
    # bit-exact nearest-neighbour copy semantics (review correctness caveat).
    sel = (h == idx).astype(jnp.float32)                    # (G, TN) one-hot
    out_ref[0] = jnp.dot(proj_ref[0], sel, preferred_element_type=jnp.float32)


def _pick_pixels_per_tile(g, gg, sel_budget_bytes=8 * 1024 * 1024):
    tn = (sel_budget_bytes // (4 * g)) // 128 * 128
    tn = max(tn, 128)
    ggp128 = -(-gg // 128) * 128
    return min(tn, ggp128)


def _stackgram_onehot(proj, trig, b, g, n_ang, pixels_per_tile, cparams):
    gg = g * g
    tn = int(pixels_per_tile) if pixels_per_tile is not None else _pick_pixels_per_tile(g, gg)
    assert tn % 128 == 0, "pixels_per_tile must be a multiple of 128"
    ggp = -(-gg // tn) * tn
    n_tiles = ggp // tn
    out = pl.pallas_call(
        _stackgram_onehot_kernel,
        out_shape=jax.ShapeDtypeStruct((n_ang, b, ggp), jnp.float32),
        grid=(n_ang, n_tiles),
        in_specs=[
            pl.BlockSpec((1, 1, 2), lambda ti, ri: (ti, 0, 0)),
            pl.BlockSpec((1, b, g), lambda ti, ri: (ti, 0, 0)),   # reused across tiles
        ],
        out_specs=pl.BlockSpec((1, b, tn), lambda ti, ri: (ti, 0, ri)),
        compiler_params=cparams,
    )(trig, proj)
    out = out[:, :, :gg].reshape(n_ang, b, g, g)
    return jnp.transpose(out, (1, 0, 2, 3))


# --------------------------------------------------------------------------
# Wrapper
# --------------------------------------------------------------------------
def stackgram(x, theta=None, out_size=None, circle=True, method="auto",
              rows_per_tile=None, pixels_per_tile=None):
    """x: [B, 1, in_size, n_theta] sinogram -> [B, n_theta, in_size, in_size]."""
    if method not in ("auto", "gather", "onehot"):
        raise ValueError(f"unknown method {method!r}")
    x = x.astype(jnp.float32)
    b, c, h, n_ang = x.shape
    assert c == 1, "Stackgram forward requires a single channel"
    if out_size is None:
        out_size = h if circle else int(math.floor(h / SQRT2))
    in_size = out_size if circle else int(math.ceil(SQRT2 * out_size))
    assert h == in_size, "x detector axis must equal in_size"
    if theta is None:
        theta = jnp.arange(180)
    theta = jnp.asarray(theta)
    assert theta.shape[0] == n_ang, "x angle axis must equal len(theta)"
    g = in_size

    # glue: angle-major projection lines (tiny vs. the G^2 output) + per-angle trig
    proj = jnp.transpose(x[:, 0], (2, 0, 1))          # (T, B, G)
    trig = _make_trig(theta)                          # (T, 1, 2)
    cparams = _compiler_params()

    if method in ("auto", "gather"):
        try:
            out = _stackgram_gather(proj, trig, b, g, n_ang, rows_per_tile, cparams)
            return jax.block_until_ready(out)
        except Exception:
            if method == "gather":
                raise
            # Mosaic could not lower the lane gather at this shape; fall back.
    return _stackgram_onehot(proj, trig, b, g, n_ang, pixels_per_tile, cparams)


# --------------------------------------------------------------------------
# Pure-JAX reference (identical index arithmetic, plain XLA gather)
# --------------------------------------------------------------------------
def _stackgram_ref(x, theta, g):
    x = x.astype(jnp.float32)
    trig = _make_trig(theta)                                   # (T, 1, 2)
    sin_t = trig[:, :, 0:1]                                    # (T, 1, 1)
    cos_t = trig[:, :, 1:2]
    jj = jnp.arange(g, dtype=jnp.float32)[None, None, :]       # (1, 1, G)
    ii = jnp.arange(g, dtype=jnp.float32)[None, :, None]       # (1, G, 1)
    iy_n, valid = _nearest_detector_index(sin_t, cos_t, ii, jj, g)   # (T, G, G)
    safe = jnp.clip(iy_n, 0, g - 1)
    proj = jnp.transpose(x[:, 0], (2, 0, 1))                   # (T, B, G)
    gathered = jax.vmap(lambda line, idx: line[:, idx])(proj, safe)  # (T, B, G, G)
    out = jnp.where(valid[:, None, :, :], gathered, 0.0)
    return jnp.transpose(out, (1, 0, 2, 3))                    # (B, T, G, G)


if __name__ == "__main__":
    key = jax.random.PRNGKey(0)
    B, C, G, T = 2, 1, 16, 8            # batch, channel, in_size, n_theta
    theta = jnp.arange(T, dtype=jnp.float32) * (180.0 / T)
    x = jax.random.normal(key, (B, C, G, T), dtype=jnp.float32)

    ref = np.asarray(jax.block_until_ready(_stackgram_ref(x, theta, G)))

    # Primary path (gather kernel; auto-falls back to the one-hot kernel if the
    # lane gather does not lower on this JAX/libtpu build).
    out = jax.block_until_ready(stackgram(x, theta=theta, out_size=G, circle=True))
    assert out.shape == (B, T, G, G)
    np.testing.assert_allclose(np.asarray(out), ref, atol=1e-5, rtol=1e-5)

    # Exercise the row-tiled (multi grid-step) path explicitly.
    out_rt = jax.block_until_ready(
        stackgram(x, theta=theta, out_size=G, circle=True, rows_per_tile=8))
    np.testing.assert_allclose(np.asarray(out_rt), ref, atol=1e-5, rtol=1e-5)

    # Exercise the guaranteed-lowerable one-hot fallback kernel explicitly
    # (including its multi-pixel-tile path).
    out_oh = jax.block_until_ready(
        stackgram(x, theta=theta, out_size=G, circle=True,
                  method="onehot", pixels_per_tile=128))
    np.testing.assert_allclose(np.asarray(out_oh), ref, atol=1e-5, rtol=1e-5)

    print("KERNEL_OK")
</pallas_src>

<mosaic_0001>
module attributes {stable_mosaic.version = 11 : i64} {
  func.func @_stackgram_gather_kernel(%arg0: i32, %arg1: i32, %arg2: memref<1x1x2xf32, #tpu.memory_space<vmem>>, %arg3: memref<1x2x16xf32, #tpu.memory_space<vmem>>, %arg4: memref<2x1x16x16xf32, #tpu.memory_space<vmem>>) attributes {dimension_semantics = [#tpu.dimension_semantics<parallel>, #tpu.dimension_semantics<parallel>], iteration_bounds = array<i64: 8, 1>, scalar_prefetch = 0 : i64, scratch_operands = 0 : i64, tpu.core_type = #tpu.core_type<tc>, window_params = [{transform_indices = @transform_0, window_bounds = array<i64: 1, 1, 2>}, {transform_indices = @transform_1, window_bounds = array<i64: 1, 2, 16>}, {transform_indices = @transform_2, window_bounds = array<i64: 2, 1, 16, 16>}]} {
    %c0 = arith.constant 0 : index
    %c0_0 = arith.constant 0 : index
    %c0_1 = arith.constant 0 : index
    %0 = vector.load %arg2[%c0, %c0_0, %c0_1] : memref<1x1x2xf32, #tpu.memory_space<vmem>>, vector<1x1x1xf32>
    %1 = vector.shape_cast %0 : vector<1x1x1xf32> to vector<1x1xf32>
    %c0_2 = arith.constant 0 : index
    %c0_3 = arith.constant 0 : index
    %c1 = arith.constant 1 : index
    %2 = vector.load %arg2[%c0_2, %c0_3, %c1] : memref<1x1x2xf32, #tpu.memory_space<vmem>>, vector<1x1x1xf32>
    %3 = vector.shape_cast %2 : vector<1x1x1xf32> to vector<1x1xf32>
    %c16_i32 = arith.constant 16 : i32
    %4 = arith.muli %arg1, %c16_i32 : i32
    %5 = arith.sitofp %4 : i32 to f32
    %6 = tpu.iota {dimensions = array<i32: 1>} : vector<16x16xi32>
    %7 = arith.sitofp %6 : vector<16x16xi32> to vector<16x16xf32>
    %8 = tpu.iota {dimensions = array<i32: 0>} : vector<16x16xi32>
    %9 = arith.sitofp %8 : vector<16x16xi32> to vector<16x16xf32>
    %10 = vector.broadcast %5 : f32 to vector<16x16xf32>
    %11 = arith.addf %9, %10 : vector<16x16xf32>
    %cst = arith.constant 2.000000e+00 : f32
    %12 = vector.broadcast %cst : f32 to vector<16x16xf32>
    %13 = arith.mulf %12, %7 : vector<16x16xf32>
    %cst_4 = arith.constant 1.000000e+00 : f32
    %14 = vector.broadcast %cst_4 : f32 to vector<16x16xf32>
    %15 = arith.addf %13, %14 : vector<16x16xf32>
    %cst_5 = arith.constant 1.600000e+01 : f32
    %16 = vector.broadcast %cst_5 : f32 to vector<16x16xf32>
    %17 = arith.divf %15, %16 : vector<16x16xf32>
    %cst_6 = arith.constant 1.000000e+00 : f32
    %18 = vector.broadcast %cst_6 : f32 to vector<16x16xf32>
    %19 = arith.subf %17, %18 : vector<16x16xf32>
    %cst_7 = arith.constant 2.000000e+00 : f32
    %20 = vector.broadcast %cst_7 : f32 to vector<16x16xf32>
    %21 = arith.mulf %20, %11 : vector<16x16xf32>
    %cst_8 = arith.constant 1.000000e+00 : f32
    %22 = vector.broadcast %cst_8 : f32 to vector<16x16xf32>
    %23 = arith.addf %21, %22 : vector<16x16xf32>
    %cst_9 = arith.constant 1.600000e+01 : f32
    %24 = vector.broadcast %cst_9 : f32 to vector<16x16xf32>
    %25 = arith.divf %23, %24 : vector<16x16xf32>
    %cst_10 = arith.constant 1.000000e+00 : f32
    %26 = vector.broadcast %cst_10 : f32 to vector<16x16xf32>
    %27 = arith.subf %25, %26 : vector<16x16xf32>
    %28 = vector.broadcast %1 : vector<1x1xf32> to vector<16x16xf32>
    %29 = arith.mulf %28, %19 : vector<16x16xf32>
    %30 = vector.broadcast %3 : vector<1x1xf32> to vector<16x16xf32>
    %31 = arith.mulf %30, %27 : vector<16x16xf32>
    %32 = arith.addf %29, %31 : vector<16x16xf32>
    %33 = vector.broadcast %3 : vector<1x1xf32> to vector<16x16xf32>
    %34 = arith.mulf %33, %19 : vector<16x16xf32>
    %35 = vector.broadcast %1 : vector<1x1xf32> to vector<16x16xf32>
    %36 = arith.mulf %35, %27 : vector<16x16xf32>
    %37 = arith.subf %34, %36 : vector<16x16xf32>
    %cst_11 = arith.constant 1.000000e+00 : f32
    %38 = vector.broadcast %cst_11 : f32 to vector<16x16xf32>
    %39 = arith.addf %32, %38 : vector<16x16xf32>
    %cst_12 = arith.constant 1.600000e+01 : f32
    %40 = vector.broadcast %cst_12 : f32 to vector<16x16xf32>
    %41 = arith.mulf %39, %40 : vector<16x16xf32>
    %cst_13 = arith.constant 1.000000e+00 : f32
    %42 = vector.broadcast %cst_13 : f32 to vector<16x16xf32>
    %43 = arith.subf %41, %42 : vector<16x16xf32>
    %cst_14 = arith.constant 5.000000e-01 : f32
    %44 = vector.broadcast %cst_14 : f32 to vector<16x16xf32>
    %45 = arith.mulf %43, %44 : vector<16x16xf32>
    %cst_15 = arith.constant 1.000000e+00 : f32
    %46 = vector.broadcast %cst_15 : f32 to vector<16x16xf32>
    %47 = arith.addf %37, %46 : vector<16x16xf32>
    %cst_16 = arith.constant 1.600000e+01 : f32
    %48 = vector.broadcast %cst_16 : f32 to vector<16x16xf32>
    %49 = arith.mulf %47, %48 : vector<16x16xf32>
    %cst_17 = arith.constant 1.000000e+00 : f32
    %50 = vector.broadcast %cst_17 : f32 to vector<16x16xf32>
    %51 = arith.subf %49, %50 : vector<16x16xf32>
    %cst_18 = arith.constant 5.000000e-01 : f32
    %52 = vector.broadcast %cst_18 : f32 to vector<16x16xf32>
    %53 = arith.mulf %51, %52 : vector<16x16xf32>
    %cst_19 = arith.constant 5.000000e-01 : f32
    %54 = vector.broadcast %cst_19 : f32 to vector<16x16xf32>
    %55 = arith.addf %45, %54 : vector<16x16xf32>
    %56 = math.floor %55 : vector<16x16xf32>
    %57 = arith.fptosi %56 : vector<16x16xf32> to vector<16x16xi32>
    %cst_20 = arith.constant 5.000000e-01 : f32
    %58 = vector.broadcast %cst_20 : f32 to vector<16x16xf32>
    %59 = arith.addf %53, %58 : vector<16x16xf32>
    %60 = math.floor %59 : vector<16x16xf32>
    %61 = arith.fptosi %60 : vector<16x16xf32> to vector<16x16xi32>
    %c0_i32 = arith.constant 0 : i32
    %62 = vector.broadcast %c0_i32 : i32 to vector<16x16xi32>
    %63 = arith.cmpi sge, %57, %62 : vector<16x16xi32>
    %c16_i32_21 = arith.constant 16 : i32
    %64 = vector.broadcast %c16_i32_21 : i32 to vector<16x16xi32>
    %65 = arith.cmpi slt, %57, %64 : vector<16x16xi32>
    %66 = arith.andi %63, %65 : vector<16x16xi1>
    %c0_i32_22 = arith.constant 0 : i32
    %67 = vector.broadcast %c0_i32_22 : i32 to vector<16x16xi32>
    %68 = arith.cmpi sge, %61, %67 : vector<16x16xi32>
    %69 = arith.andi %66, %68 : vector<16x16xi1>
    %c16_i32_23 = arith.constant 16 : i32
    %70 = vector.broadcast %c16_i32_23 : i32 to vector<16x16xi32>
    %71 = arith.cmpi slt, %61, %70 : vector<16x16xi32>
    %72 = arith.andi %69, %71 : vector<16x16xi1>
    %c0_i32_24 = arith.constant 0 : i32
    %c15_i32 = arith.constant 15 : i32
    %73 = vector.broadcast %c0_i32_24 : i32 to vector<16x16xi32>
    %74 = arith.maxsi %73, %61 : vector<16x16xi32>
    %75 = vector.broadcast %c15_i32 : i32 to vector<16x16xi32>
    %76 = arith.minsi %75, %74 : vector<16x16xi32>
    %c0_25 = arith.constant 0 : index
    %c0_26 = arith.constant 0 : index
    %c0_27 = arith.constant 0 : index
    %77 = vector.load %arg3[%c0_25, %c0_26, %c0_27] : memref<1x2x16xf32, #tpu.memory_space<vmem>>, vector<1x1x16xf32>
    %78 = vector.shape_cast %77 : vector<1x1x16xf32> to vector<1x16xf32>
    %79 = vector.shape_cast %78 : vector<1x16xf32> to vector<1x16xf32>
    %80 = vector.broadcast %79 : vector<1x16xf32> to vector<16x16xf32>
    %c0_i32_28 = arith.constant 0 : i32
    %81 = vector.broadcast %c0_i32_28 : i32 to vector<16x16xi32>
    %82 = arith.cmpi slt, %76, %81 : vector<16x16xi32>
    %c16_i32_29 = arith.constant 16 : i32
    %83 = vector.broadcast %c16_i32_29 : i32 to vector<16x16xi32>
    %84 = arith.addi %76, %83 : vector<16x16xi32>
    %85 = arith.select %82, %84, %76 : vector<16x16xi1>, vector<16x16xi32>
    %86 = vector.shape_cast %85 : vector<16x16xi32> to vector<16x16x1xi32>
    %87 = vector.shape_cast %86 : vector<16x16x1xi32> to vector<16x16xi32>
    %88 = tpu.dynamic_gather %80[%87] in [1] : vector<16x16xf32>, vector<16x16xi32> -> vector<16x16xf32>
    %cst_30 = arith.constant 0.000000e+00 : f32
    %89 = vector.broadcast %cst_30 : f32 to vector<16x16xf32>
    %90 = arith.select %72, %88, %89 : vector<16x16xi1>, vector<16x16xf32>
    %c0_31 = arith.constant 0 : index
    %c0_32 = arith.constant 0 : index
    %c0_33 = arith.constant 0 : index
    %c0_34 = arith.constant 0 : index
    %91 = vector.load %arg4[%c0_31, %c0_32, %c0_33, %c0_34] : memref<2x1x16x16xf32, #tpu.memory_space<vmem>>, vector<1x1x16x16xf32>
    %92 = vector.shape_cast %91 : vector<1x1x16x16xf32> to vector<16x16xf32>
    %93 = vector.shape_cast %90 : vector<16x16xf32> to vector<1x1x16x16xf32>
    tpu.vector_store %arg4[%c0_31, %c0_32, %c0_33, %c0_34], %93 {strides = array<i32>} : memref<2x1x16x16xf32, #tpu.memory_space<vmem>>, vector<1x1x16x16xf32>,
    %c0_35 = arith.constant 0 : index
    %c1_36 = arith.constant 1 : index
    %c0_37 = arith.constant 0 : index
    %94 = vector.load %arg3[%c0_35, %c1_36, %c0_37] : memref<1x2x16xf32, #tpu.memory_space<vmem>>, vector<1x1x16xf32>
    %95 = vector.shape_cast %94 : vector<1x1x16xf32> to vector<1x16xf32>
    %96 = vector.shape_cast %95 : vector<1x16xf32> to vector<1x16xf32>
    %97 = vector.broadcast %96 : vector<1x16xf32> to vector<16x16xf32>
    %c0_i32_38 = arith.constant 0 : i32
    %98 = vector.broadcast %c0_i32_38 : i32 to vector<16x16xi32>
    %99 = arith.cmpi slt, %76, %98 : vector<16x16xi32>
    %c16_i32_39 = arith.constant 16 : i32
    %100 = vector.broadcast %c16_i32_39 : i32 to vector<16x16xi32>
    %101 = arith.addi %76, %100 : vector<16x16xi32>
    %102 = arith.select %99, %101, %76 : vector<16x16xi1>, vector<16x16xi32>
    %103 = vector.shape_cast %102 : vector<16x16xi32> to vector<16x16x1xi32>
    %104 = vector.shape_cast %103 : vector<16x16x1xi32> to vector<16x16xi32>
    %105 = tpu.dynamic_gather %97[%104] in [1] : vector<16x16xf32>, vector<16x16xi32> -> vector<16x16xf32>
    %cst_40 = arith.constant 0.000000e+00 : f32
    %106 = vector.broadcast %cst_40 : f32 to vector<16x16xf32>
    %107 = arith.select %72, %105, %106 : vector<16x16xi1>, vector<16x16xf32>
    %c1_41 = arith.constant 1 : index
    %c0_42 = arith.constant 0 : index
    %c0_43 = arith.constant 0 : index
    %c0_44 = arith.constant 0 : index
    %108 = vector.load %arg4[%c1_41, %c0_42, %c0_43, %c0_44] : memref<2x1x16x16xf32, #tpu.memory_space<vmem>>, vector<1x1x16x16xf32>
    %109 = vector.shape_cast %108 : vector<1x1x16x16xf32> to vector<16x16xf32>
    %110 = vector.shape_cast %107 : vector<16x16xf32> to vector<1x1x16x16xf32>
    tpu.vector_store %arg4[%c1_41, %c0_42, %c0_43, %c0_44], %110 {strides = array<i32>} : memref<2x1x16x16xf32, #tpu.memory_space<vmem>>, vector<1x1x16x16xf32>,
    return
  }
  func.func @transform_0(%arg0: i32, %arg1: i32) -> (i32, i32, i32) {
    %c0_i32 = arith.constant 0 : i32
    %c0_i32_0 = arith.constant 0 : i32
    %c0_i32_1 = arith.constant 0 : i32
    return %arg0, %c0_i32, %c0_i32_0 : i32, i32, i32
  }
  func.func @transform_1(%arg0: i32, %arg1: i32) -> (i32, i32, i32) {
    %c0_i32 = arith.constant 0 : i32
    %c0_i32_0 = arith.constant 0 : i32
    %c0_i32_1 = arith.constant 0 : i32
    return %arg0, %c0_i32, %c0_i32_0 : i32, i32, i32
  }
  func.func @transform_2(%arg0: i32, %arg1: i32) -> (i32, i32, i32, i32) {
    %c0_i32 = arith.constant 0 : i32
    %c0_i32_0 = arith.constant 0 : i32
    %c0_i32_1 = arith.constant 0 : i32
    return %c0_i32, %arg0, %arg1, %c0_i32_0 : i32, i32, i32, i32
  }
}

module attributes {stable_mosaic.version = 11 : i64} {
  func.func @_stackgram_onehot_kernel(%arg0: i32, %arg1: i32, %arg2: memref<1x1x2xf32, #tpu.memory_space<vmem>>, %arg3: memref<1x2x16xf32, #tpu.memory_space<vmem>>, %arg4: memref<1x2x256xf32, #tpu.memory_space<vmem>>) attributes {dimension_semantics = [#tpu.dimension_semantics<parallel>, #tpu.dimension_semantics<parallel>], iteration_bounds = array<i64: 8, 1>, scalar_prefetch = 0 : i64, scratch_operands = 0 : i64, tpu.core_type = #tpu.core_type<tc>, window_params = [{transform_indices = @transform_0, window_bounds = array<i64: 1, 1, 2>}, {transform_indices = @transform_1, window_bounds = array<i64: 1, 2, 16>}, {transform_indices = @transform_2, window_bounds = array<i64: 1, 2, 256>}]} {
    %c0 = arith.constant 0 : index
    %c0_0 = arith.constant 0 : index
    %c0_1 = arith.constant 0 : index
    %0 = vector.load %arg2[%c0, %c0_0, %c0_1] : memref<1x1x2xf32, #tpu.memory_space<vmem>>, vector<1x1x1xf32>
    %1 = vector.shape_cast %0 : vector<1x1x1xf32> to vector<1x1xf32>
    %c0_2 = arith.constant 0 : index
    %c0_3 = arith.constant 0 : index
    %c1 = arith.constant 1 : index
    %2 = vector.load %arg2[%c0_2, %c0_3, %c1] : memref<1x1x2xf32, #tpu.memory_space<vmem>>, vector<1x1x1xf32>
    %3 = vector.shape_cast %2 : vector<1x1x1xf32> to vector<1x1xf32>
    %c256_i32 = arith.constant 256 : i32
    %4 = arith.muli %arg1, %c256_i32 : i32
    %5 = tpu.iota {dimensions = array<i32: 1>} : vector<1x256xi32>
    %6 = vector.broadcast %4 : i32 to vector<1x256xi32>
    %7 = arith.addi %5, %6 : vector<1x256xi32>
    %8 = arith.sitofp %7 : vector<1x256xi32> to vector<1x256xf32>
    %cst = arith.constant 1.600000e+01 : f32
    %9 = vector.broadcast %cst : f32 to vector<1x256xf32>
    %10 = arith.divf %8, %9 : vector<1x256xf32>
    %11 = math.floor %10 : vector<1x256xf32>
    %cst_4 = arith.constant 1.600000e+01 : f32
    %12 = vector.broadcast %cst_4 : f32 to vector<1x256xf32>
    %13 = arith.mulf %11, %12 : vector<1x256xf32>
    %14 = arith.subf %8, %13 : vector<1x256xf32>
    %cst_5 = arith.constant 2.000000e+00 : f32
    %15 = vector.broadcast %cst_5 : f32 to vector<1x256xf32>
    %16 = arith.mulf %15, %14 : vector<1x256xf32>
    %cst_6 = arith.constant 1.000000e+00 : f32
    %17 = vector.broadcast %cst_6 : f32 to vector<1x256xf32>
    %18 = arith.addf %16, %17 : vector<1x256xf32>
    %cst_7 = arith.constant 1.600000e+01 : f32
    %19 = vector.broadcast %cst_7 : f32 to vector<1x256xf32>
    %20 = arith.divf %18, %19 : vector<1x256xf32>
    %cst_8 = arith.constant 1.000000e+00 : f32
    %21 = vector.broadcast %cst_8 : f32 to vector<1x256xf32>
    %22 = arith.subf %20, %21 : vector<1x256xf32>
    %cst_9 = arith.constant 2.000000e+00 : f32
    %23 = vector.broadcast %cst_9 : f32 to vector<1x256xf32>
    %24 = arith.mulf %23, %11 : vector<1x256xf32>
    %cst_10 = arith.constant 1.000000e+00 : f32
    %25 = vector.broadcast %cst_10 : f32 to vector<1x256xf32>
    %26 = arith.addf %24, %25 : vector<1x256xf32>
    %cst_11 = arith.constant 1.600000e+01 : f32
    %27 = vector.broadcast %cst_11 : f32 to vector<1x256xf32>
    %28 = arith.divf %26, %27 : vector<1x256xf32>
    %cst_12 = arith.constant 1.000000e+00 : f32
    %29 = vector.broadcast %cst_12 : f32 to vector<1x256xf32>
    %30 = arith.subf %28, %29 : vector<1x256xf32>
    %31 = vector.broadcast %1 : vector<1x1xf32> to vector<1x256xf32>
    %32 = arith.mulf %31, %22 : vector<1x256xf32>
    %33 = vector.broadcast %3 : vector<1x1xf32> to vector<1x256xf32>
    %34 = arith.mulf %33, %30 : vector<1x256xf32>
    %35 = arith.addf %32, %34 : vector<1x256xf32>
    %36 = vector.broadcast %3 : vector<1x1xf32> to vector<1x256xf32>
    %37 = arith.mulf %36, %22 : vector<1x256xf32>
    %38 = vector.broadcast %1 : vector<1x1xf32> to vector<1x256xf32>
    %39 = arith.mulf %38, %30 : vector<1x256xf32>
    %40 = arith.subf %37, %39 : vector<1x256xf32>
    %cst_13 = arith.constant 1.000000e+00 : f32
    %41 = vector.broadcast %cst_13 : f32 to vector<1x256xf32>
    %42 = arith.addf %35, %41 : vector<1x256xf32>
    %cst_14 = arith.constant 1.600000e+01 : f32
    %43 = vector.broadcast %cst_14 : f32 to vector<1x256xf32>
    %44 = arith.mulf %42, %43 : vector<1x256xf32>
    %cst_15 = arith.constant 1.000000e+00 : f32
    %45 = vector.broadcast %cst_15 : f32 to vector<1x256xf32>
    %46 = arith.subf %44, %45 : vector<1x256xf32>
    %cst_16 = arith.constant 5.000000e-01 : f32
    %47 = vector.broadcast %cst_16 : f32 to vector<1x256xf32>
    %48 = arith.mulf %46, %47 : vector<1x256xf32>
    %cst_17 = arith.constant 1.000000e+00 : f32
    %49 = vector.broadcast %cst_17 : f32 to vector<1x256xf32>
    %50 = arith.addf %40, %49 : vector<1x256xf32>
    %cst_18 = arith.constant 1.600000e+01 : f32
    %51 = vector.broadcast %cst_18 : f32 to vector<1x256xf32>
    %52 = arith.mulf %50, %51 : vector<1x256xf32>
    %cst_19 = arith.constant 1.000000e+00 : f32
    %53 = vector.broadcast %cst_19 : f32 to vector<1x256xf32>
    %54 = arith.subf %52, %53 : vector<1x256xf32>
    %cst_20 = arith.constant 5.000000e-01 : f32
    %55 = vector.broadcast %cst_20 : f32 to vector<1x256xf32>
    %56 = arith.mulf %54, %55 : vector<1x256xf32>
    %cst_21 = arith.constant 5.000000e-01 : f32
    %57 = vector.broadcast %cst_21 : f32 to vector<1x256xf32>
    %58 = arith.addf %48, %57 : vector<1x256xf32>
    %59 = math.floor %58 : vector<1x256xf32>
    %60 = arith.fptosi %59 : vector<1x256xf32> to vector<1x256xi32>
    %cst_22 = arith.constant 5.000000e-01 : f32
    %61 = vector.broadcast %cst_22 : f32 to vector<1x256xf32>
    %62 = arith.addf %56, %61 : vector<1x256xf32>
    %63 = math.floor %62 : vector<1x256xf32>
    %64 = arith.fptosi %63 : vector<1x256xf32> to vector<1x256xi32>
    %c0_i32 = arith.constant 0 : i32
    %65 = vector.broadcast %c0_i32 : i32 to vector<1x256xi32>
    %66 = arith.cmpi sge, %60, %65 : vector<1x256xi32>
    %c16_i32 = arith.constant 16 : i32
    %67 = vector.broadcast %c16_i32 : i32 to vector<1x256xi32>
    %68 = arith.cmpi slt, %60, %67 : vector<1x256xi32>
    %69 = arith.andi %66, %68 : vector<1x256xi1>
    %c0_i32_23 = arith.constant 0 : i32
    %70 = vector.broadcast %c0_i32_23 : i32 to vector<1x256xi32>
    %71 = arith.cmpi sge, %64, %70 : vector<1x256xi32>
    %72 = arith.andi %69, %71 : vector<1x256xi1>
    %c16_i32_24 = arith.constant 16 : i32
    %73 = vector.broadcast %c16_i32_24 : i32 to vector<1x256xi32>
    %74 = arith.cmpi slt, %64, %73 : vector<1x256xi32>
    %75 = arith.andi %72, %74 : vector<1x256xi1>
    %c-1_i32 = arith.constant -1 : i32
    %76 = vector.broadcast %c-1_i32 : i32 to vector<1x256xi32>
    %77 = arith.select %75, %64, %76 : vector<1x256xi1>, vector<1x256xi32>
    %78 = tpu.iota {dimensions = array<i32: 0>} : vector<16x256xi32>
    %79 = vector.broadcast %77 : vector<1x256xi32> to vector<16x256xi32>
    %80 = arith.cmpi eq, %78, %79 : vector<16x256xi32>
    %81 = arith.extui %80 : vector<16x256xi1> to vector<16x256xi32>
    %82 = arith.sitofp %81 : vector<16x256xi32> to vector<16x256xf32>
    %c0_25 = arith.constant 0 : index
    %c0_26 = arith.constant 0 : index
    %c0_27 = arith.constant 0 : index
    %83 = vector.load %arg3[%c0_25, %c0_26, %c0_27] : memref<1x2x16xf32, #tpu.memory_space<vmem>>, vector<1x2x16xf32>
    %84 = vector.shape_cast %83 : vector<1x2x16xf32> to vector<2x16xf32>
    %cst_28 = arith.constant dense<0.000000e+00> : vector<2x256xf32>
    %85 = tpu.matmul %84, %82, %cst_28 {dimension_numbers = #tpu.dot_dimension_numbers<[1], [0], [0], [1], [0, 0, 1, 1], [], []>} : vector<2x16xf32>, vector<16x256xf32>, vector<2x256xf32> -> vector<2x256xf32>
    %c0_29 = arith.constant 0 : index
    %c0_30 = arith.constant 0 : index
    %c0_31 = arith.constant 0 : index
    %86 = vector.load %arg4[%c0_29, %c0_30, %c0_31] : memref<1x2x256xf32, #tpu.memory_space<vmem>>, vector<1x2x256xf32>
    %87 = vector.shape_cast %86 : vector<1x2x256xf32> to vector<2x256xf32>
    %88 = vector.shape_cast %85 : vector<2x256xf32> to vector<1x2x256xf32>
    tpu.vector_store %arg4[%c0_29, %c0_30, %c0_31], %88 {strides = array<i32>} : memref<1x2x256xf32, #tpu.memory_space<vmem>>, vector<1x2x256xf32>,
    return
  }
  func.func @transform_0(%arg0: i32, %arg1: i32) -> (i32, i32, i32) {
    %c0_i32 = arith.constant 0 : i32
    %c0_i32_0 = arith.constant 0 : i32
    %c0_i32_1 = arith.constant 0 : i32
    return %arg0, %c0_i32, %c0_i32_0 : i32, i32, i32
  }
  func.func @transform_1(%arg0: i32, %arg1: i32) -> (i32, i32, i32) {
    %c0_i32 = arith.constant 0 : i32
    %c0_i32_0 = arith.constant 0 : i32
    %c0_i32_1 = arith.constant 0 : i32
    return %arg0, %c0_i32, %c0_i32_0 : i32, i32, i32
  }
  func.func @transform_2(%arg0: i32, %arg1: i32) -> (i32, i32, i32) {
    %c0_i32 = arith.constant 0 : i32
    %c0_i32_0 = arith.constant 0 : i32
    return %arg0, %c0_i32, %arg1 : i32, i32, i32
  }
}

</mosaic_0001>

<bundles_post_ra>
// kernel: tpu_custom_call.1
= control target key start
LH: loop header
LB: loop body
LE: loop exit
PB: predicated region body
PF: predicated region fallthrough
CT: control target
= control target key end

     0   :  { %7 = vsyncpa [#allocation3], 0  ;;  %s840_s0 = inlined_call_operand.vmem [shape: f32[8,1,2], index: 0, kind: input, shape index: {}]   ;;  %s841_s1 = inlined_call_operand.hbm [shape: f32[8,2,16], index: 1, kind: input, shape index: {}]   ;;  %s842_s2 = inlined_call_operand.hbm [shape: f32[2,8,16,16], index: 2, kind: output, shape index: {}]  }
   0x1   :  { %9 = vsyncpa [#allocation3 + $0x1], 0 }
   0x2   :  { %10 = vsyncpa [#allocation4], 0 }
   0x3   :  { %12 = vsyncpa [#allocation4 + $0x1], 0  ;;  %s692_s9 = smov 0   ;;  %s694_s10 = smov 0  }
   0x4   :  { %s696_s11 = smov 0   ;;  %s698_s12 = smov 0  }
   0x5   :  { %s700_s13 = smov 0   ;;  %s702_s14 = smov 0  }
   0x6 LB: > { %s459_s15 = sadd.s32 4294967295, %s665_s14   ;;  %s460_s16 = sadd.s32 4294967294, %s665_s14   ;;  %s665_s14 = sphi %s702_s14, %s18_s14   ;;  %s661_s13 = sphi %s700_s13, %s855_s13   ;;  %s657_s12 = sphi %s698_s12, %s854_s12   ;;  %s653_s11 = sphi %s696_s11, %s853_s11   ;;  %s649_s10 = sphi %s694_s10, %s852_s10   ;;  %s645_s9 = sphi %s692_s9, %s851_s9  }
   0x7   : > { %s30_s17 = sadd.s32 1, %s661_s13  ;;  %s63_s18 = sadd.s32 1, %s653_s11 }
   0x8   : > { %p32_p0 = scmp.ge.s32.totalorder %s30_s17, 8  ;;  %p70_p1 = scmp.ne.s32.totalorder %s653_s11, %s649_s10 }
   0x9   : > { %p71_p2 = scmp.eq.s32.totalorder %s665_s14, 0  ;;  %p76_p3 = scmp.ne.s32.totalorder %s649_s10, %s645_s9 }
   0xa   : > { %s857_s17 = smov (%p32_p0, %s30_s17), 0  ;;  %p77_p5 = scmp.eq.s32.totalorder %s459_s15, 0 }
   0xb   : > { %p733_p4 = por %p71_p2, %p70_p1  ;;  %s60_s20 = ssub.s32 %s661_s13, %s857_s17 }
   0xc   : > { %p102_p6 = scmp.eq.s32.totalorder %s459_s15, 7  ;;  %p61_p7 = scmp.eq.s32.totalorder %s60_s20, 0 }
   0xd   : > { %p739_p8 = por %p77_p5, %p76_p3  ;;  %p108_p10 = scmp.eq.s32.totalorder %s460_s16, 7 }
   0xe   : > { %p743_p9 = por %p102_p6, %p70_p1  ;;  %p509_p12 = scmp.lt.s32.totalorder %s665_s14, 8 }
   0xf   : > { %s748_s23 = scalar_select %p61_p7, %s653_s11, %s63_s18  }
  0x10   : > { %p750_p11 = por %p108_p10, %p76_p3  ;;  %s134_s25 = sand.u32 1, %s653_s11  }
  0x11   : > { %s463_s26 = sshll.u32 %s134_s25, 1  ;;  %s464_s27 = sshll.u32 %s661_s13, 1 }
  0x12   : > { %s142_s30 = scalar_lea.hbm %s841_s1, %s464_s27  ;;  %s138_s3 = scalar_lea.vmem [#allocation2], %s463_s26 }
  0x13   : > { %s146_s4 = sshll.u32 %s138_s3, 4  ;;  %s144_s5 = sshll.u32 %s142_s30, 4  ;;  %s147_s4 = int_to_ptr.vmem [resolvable:$true] %s146_s4  ;;  %s145_s5 = int_to_ptr.hbm [resolvable:$true] %s144_s5 }
  0x14   : > { %p502_p13 = pnand %p509_p12, %p733_p4  ;;  %p465_p0 = scmp.ge.s32.totalorder %s665_s14, 1 }
  0x15   : > { %p151_p1 = scmp.lt.s32.totalorder %s665_s14, 9  ;;  %s135_s6 = scalar_lea.sflag [#allocation3], %s134_s25 }
  0x16   : > { %504 = dma.hbm_to_vmem [thread:$0]  (!%p502_p13), %s145_s5, 32, %s147_s4, %s135_s6  }
  0x17   : > { %p152_p2 = pnand %p465_p0, %p151_p1 }
  0x18   : > { %s765_s7 = sand.u32 (!%p152_p2), 1, %s649_s10  }
  0x19   : > { %155 = sbr.rel (%p152_p2) target bundleno = 338 (0x152), region = 28  ;;  %s466_s8 = sshll.u32 (!%p152_p2), %s765_s7, 1 }
  0x1a   : > { %s158_s15 = scalar_lea.sflag (!%p152_p2), [#allocation3], %s765_s7  ;;  %s769_s16 = scalar_lea.vmem (!%p152_p2), [#allocation2], %s466_s8 }
  0x1e   : > { %636 = dma.done.wait (%p739_p8), %s158_s15, 32  }
  0x1f   : > { %638 = vsyncadd (%p739_p8), %s158_s15, 4294967264  ;;  %p186_p3 = scmp.lt.s32.totalorder %s657_s12, 7  ;;  %v667_v0 = vmov 0   ;;  %v668_v2 = vmov 1   ;;  %v669_v3 = vmov 16.0   ;;  %v193_v6 = vlaneseq  ;;  %s467_s21 = sshll.u32 %s765_s7, 5 }
  0x20   : > { %569 = vset.pattern.permute.xlu0 %v667_v0  ;;  %579 = vrcp.f32 %v669_v3  ;;  %s185_s26 = scalar_lea.vmem [#allocation5], %s467_s21  ;;  %s326_s27 = scalar_lea.sflag [#allocation4], %s765_s7 }
  0x21   : > { %s187_s18 = scalar_select %p186_p3, %s657_s12, 7  ;;  %v194_v7 = vand.u32 127, %v193_v6  ;;  %v197_v10 = vshrl.u32 %v193_v6, 7 }
  0x23   : > { %s188_s25 = scalar_lea.vmem %s840_s0, %s187_s18  ;;  %v195_v9 = vcvt.s32.f32 %v194_v7  ;;  %v198_v13 = vadd.s32 8, %v197_v10  ;;  %v199_v15 = vcvt.s32.f32 %v197_v10 }
  0x24   : > { %v576_v1 = vld [vmem:[%s188_s25] ss:$0 sm:$0xff] }
  0x25   : > { %226 = vperm.xlu0 %569, %v576_v1   ;;  %v204_v12 = vmul.f32 2.0, %v195_v9  ;;  %v200_v17 = vcvt.s32.f32 %v198_v13  ;;  %v215_v20 = vmul.f32 2.0, %v199_v15  ;;  %v577_v15 = vld [vmem:[%s769_s16 + $0x1] ss:$0 sm:$0xff] }
  0x26   : > { %v580_v4 = vpop.eup %579 }
  0x27   : > { %v207_v5 = vmul.f32 16.0, %v580_v4  ;;  %vm211_vm0 = vweird.f32 %v580_v4  ;;  %v205_v16 = vadd.f32 1.0, %v204_v12  ;;  %v216_v21 = vmul.f32 2.0, %v200_v17 }
  0x28   : > { %v217_v23 = vadd.f32 1.0, %v215_v20 }
  0x29   : > { %v208_v8 = vsub.f32 1.0, %v207_v5  ;;  %v218_v24 = vadd.f32 1.0, %v216_v21 }
  0x2b   : > { %v209_v11 = vmul.f32 %v580_v4, %v208_v8 }
  0x2d   : > { %570 = vset.pattern.permute.xlu0 %v668_v2  ;;  %v210_v14 = vadd.f32 %v580_v4, %v209_v11 }
  0x2e   : > { %231 = vperm.xlu0 %570, %v576_v1  }
  0x2f   : > { %v212_v18 = vsel %vm211_vm0, %v580_v4, %v210_v14 }
  0x30   : > { %v213_v19 = vmul.f32 %v212_v18, %v205_v16  ;;  %v219_v26 = vmul.f32 %v217_v23, %v212_v18  ;;  %v220_v28 = vmul.f32 %v218_v24, %v212_v18  ;;  %v578_v16 = vld [vmem:[%s769_s16] ss:$0 sm:$0xff] }
  0x32   : > { %v468_v22 = vadd.f32 -1.0, %v213_v19  ;;  %v469_v29 = vadd.f32 -1.0, %v219_v26  ;;  %v470_v30 = vadd.f32 -1.0, %v220_v28 }
  0x97   : > { %v227_v25 = vpop.permute.xlu0 %226 }
  0x98   : > { %v229_v27 = vmul.f32 %v468_v22, %v227_v25  ;;  %v239_v31 = vmul.f32 %v469_v29, %v227_v25  ;;  %v240_v33 = vmul.f32 %v470_v30, %v227_v25 }
  0xa0   : > { %v232_v32 = vpop.permute.xlu0 %231 }
  0xa1   : > { %v234_v34 = vmul.f32 %v469_v29, %v232_v32  ;;  %v235_v35 = vmul.f32 %v470_v30, %v232_v32  ;;  %v238_v36 = vmul.f32 %v468_v22, %v232_v32 }
  0xa3   : > { %v236_v37 = vadd.f32 %v234_v34, %v229_v27  ;;  %v237_v38 = vadd.f32 %v235_v35, %v229_v27  ;;  %v241_v39 = vsub.f32 %v238_v36, %v239_v31  ;;  %v242_v40 = vsub.f32 %v238_v36, %v240_v33 }
  0xa5   : > { %v243_v41 = vadd.f32 1.0, %v236_v37  ;;  %v244_v42 = vadd.f32 1.0, %v237_v38  ;;  %v251_v43 = vadd.f32 1.0, %v241_v39  ;;  %v252_v44 = vadd.f32 1.0, %v242_v40 }
  0xa7   : > { %v245_v45 = vmul.f32 16.0, %v243_v41  ;;  %v246_v46 = vmul.f32 16.0, %v244_v42  ;;  %v253_v47 = vmul.f32 16.0, %v251_v43  ;;  %v254_v48 = vmul.f32 16.0, %v252_v44 }
  0xa9   : > { %v471_v49 = vadd.f32 -1.0, %v245_v45  ;;  %v472_v50 = vadd.f32 -1.0, %v246_v46  ;;  %v473_v51 = vadd.f32 -1.0, %v253_v47  ;;  %v474_v52 = vadd.f32 -1.0, %v254_v48 }
  0xab   : > { %v249_v53 = vmul.f32 0.5, %v471_v49  ;;  %v250_v54 = vmul.f32 0.5, %v472_v50  ;;  %v257_v55 = vmul.f32 0.5, %v473_v51  ;;  %v258_v56 = vmul.f32 0.5, %v474_v52 }
  0xad   : > { %v259_v57 = vadd.f32 0.5, %v249_v53  ;;  %v260_v58 = vadd.f32 0.5, %v250_v54  ;;  %v265_v59 = vadd.f32 0.5, %v257_v55  ;;  %v266_v60 = vadd.f32 0.5, %v258_v56 }
  0xaf   : > { %v261_v61 = vfloor.f32 %v259_v57  ;;  %v262_v62 = vfloor.f32 %v260_v58  ;;  %v267_v63 = vfloor.f32 %v265_v59  ;;  %v268_v0 = vfloor.f32 %v266_v60 }
  0xb1   : > { %v488_v1 = vcvt.f32.s32 %v267_v63  ;;  %v490_v2 = vcvt.f32.s32 %v268_v0  ;;  %v484_v3 = vcvt.f32.s32 %v261_v61  ;;  %v486_v4 = vcvt.f32.s32 %v262_v62 }
  0xb3   : > { %vm287_vm1 = vcmp.gt.s32.totalorder %v490_v2, 0  ;;  %vm285_vm2 = vcmp.gt.s32.totalorder %v488_v1, 0  ;;  %vm271_vm3 = vcmp.ge.s32.totalorder %v484_v3, 0  ;;  %vm273_vm4 = vcmp.lt.s32.totalorder %v484_v3, 16 }
  0xb4   : > { %v288_v5 = vsel %vm287_vm1, %v490_v2, 0  ;;  %v286_v6 = vsel %vm285_vm2, %v488_v1, 0  ;;  %vm277_vm5 = vcmp.ge.s32.totalorder %v488_v1, 0  ;;  %vm275_vm8 = vmand %vm271_vm3, %vm273_vm4  ;;  %vm281_vm9 = vcmp.lt.s32.totalorder %v488_v1, 16 }
  0xb5   : > { %vm291_vm6 = vcmp.lt.s32.totalorder %v288_v5, 15  ;;  %vm289_vm7 = vcmp.lt.s32.totalorder %v286_v6, 15  ;;  %vm279_vm10 = vmand %vm275_vm8, %vm277_vm5  ;;  %vm278_vm11 = vcmp.ge.s32.totalorder %v490_v2, 0  ;;  %vm272_vm12 = vcmp.ge.s32.totalorder %v486_v4, 0 }
  0xb6   : > { %v292_v7 = vsel %vm291_vm6, %v288_v5, 15  ;;  %v290_v8 = vsel %vm289_vm7, %v286_v6, 15  ;;  %vm780_vm15 = vmand %vm279_vm10, %vm281_vm9  ;;  %vm274_vm0 = vcmp.lt.s32.totalorder %v486_v4, 16  ;;  %vm282_vm2 = vcmp.lt.s32.totalorder %v490_v2, 16 }
  0xb7   : > { %vm296_vm13 = vcmp.lt.s32.totalorder %v292_v7, 0  ;;  %v298_v9 = vadd.s32 16, %v292_v7  ;;  %vm295_vm14 = vcmp.lt.s32.totalorder %v290_v8, 0  ;;  %v297_v10 = vadd.s32 16, %v290_v8  ;;  %vm276_vm1 = vmand %vm272_vm12, %vm274_vm0 }
  0xb8   : > { %vm280_vm3 = vmand %vm276_vm1, %vm278_vm11  ;;  %vm309_vm5 = vcmask 130048  }
  0xb9   : > { %v300_v12 = vsel %vm296_vm13, %v298_v9, %v292_v7  ;;  %v299_v13 = vsel %vm295_vm14, %v297_v10, %v290_v8  ;;  %vm784_vm4 = vmand %vm280_vm3, %vm282_vm2 }
  0xba   : > { %575 = vset.pattern.permute.xlu0 %v300_v12  ;;  %573 = vset.pattern.permute.xlu2 %v299_v13 }
  0xbb   : > { %571 = vset.pattern.permute.xlu1 %v299_v13 }
  0xc2   : > { %315 = vperm.xlu2 %573, %v577_v15  }
  0xc3   : > { %302 = vperm.xlu1 %571, %v578_v16  }
  0xca   : > { %574 = vset.pattern.permute.xlu2 %v300_v12 }
  0xcb   : > { %572 = vset.pattern.permute.xlu1 %v300_v12 }
  0xd2   : > { %318 = vperm.xlu2 %574, %v577_v15  }
  0xd3   : > { %305 = vperm.xlu1 %572, %v578_v16  }
 0x11c   : > { %v316_v17 = vpop.permute.xlu2 %315 }
 0x11d   : > { %v320_v18 = vsel %vm780_vm15, %v316_v17, 0.0 }
 0x11e   : > { %475 = vst.msk [vmem:[%s185_s26 + $0x10] sm:$0xff] %vm309_vm5, %v320_v18 }
 0x12c   : > { %v319_v19 = vpop.permute.xlu2 %318 }
 0x12d   : > { %v321_v20 = vsel %vm784_vm4, %v319_v19, 0.0 }
 0x12e   : > { %476 = vst.msk [vmem:[%s185_s26 + $0x18] sm:$0xff] %vm309_vm5, %v321_v20 }
 0x135   : > { %v303_v21 = vpop.permute.xlu1 %302 }
 0x136   : > { %v307_v22 = vsel %vm780_vm15, %v303_v21, 0.0 }
 0x137   : > { %310 = vst.msk [vmem:[%s185_s26] sm:$0xff] %vm309_vm5, %v307_v22 }
 0x145   : > { %v306_v23 = vpop.permute.xlu1 %305 }
 0x146   : > { %v308_v24 = vsel %vm784_vm4, %v306_v23, 0.0 }
 0x147   : > { %311 = vst.msk [vmem:[%s185_s26 + $0x8] sm:$0xff] %vm309_vm5, %v308_v24 }
 0x148   : > { %s482_s28 = sshll.u32 %s657_s12, 4  ;;  %s350_s29 = sshll.u32 %s185_s26, 4  ;;  %s351_s29 = int_to_ptr.vmem [resolvable:$true] %s350_s29 }
 0x149   : > { %s339_s4 = scalar_lea.hbm %s842_s2, %s482_s28  ;;  %s670_s6 = smov 256  }
 0x14a   : > { %s352_s5 = sshll.u32 %s339_s4, 4  ;;  %493 = sst [smem:[#allocation7]] (%p743_p9), %s670_s6  ;;  %s353_s5 = int_to_ptr.hbm [resolvable:$true] %s352_s5 }
 0x14b   : > { %s671_s7 = smov 2048   ;;  %s672_s8 = smov 2  }
 0x14c   : > { %494 = sst [smem:[#allocation7 + $0x1]] (%p743_p9), %s671_s7  ;;  %s673_s12 = smov 128  }
 0x14d   : > { %495 = sst [smem:[#allocation7 + $0x2]] (%p743_p9), %s672_s8  ;;  %s674_s15 = smov 8  }
 0x14e   : > { %496 = sst [smem:[#allocation7 + $0x3]] (%p743_p9), %s673_s12  ;;  %s675_s16 = smov [#allocation6]  }
 0x14f   : > { %497 = sst [smem:[#allocation7 + $0x4]] (%p743_p9), %s673_s12  ;;  %s676_s18 = smov 0  }
 0x150   : > { %498 = sst [smem:[#allocation7 + $0x5]] (%p743_p9), %s674_s15 }
 0x151   : > { %499 = dma.general (%p743_p9), %s351_s29, 512, %s353_s5, %s326_s27, %s675_s16, [#allocation7], %s676_s18, 0  }
 0x152 PF: > { %p510_p4 = scmp.ge.s32.totalorder %s665_s14, 2  ;;  %s380_s19 = sand.u32 1, %s645_s9  }
 0x153   : > { %s381_s20 = scalar_lea.sflag [#allocation4], %s380_s19 }
 0x154   : > { %p506_p5 = pnand %p510_p4, %p750_p11 }
 0x156   : > { %p507_p6 = pneg %p506_p5 }
 0x158   : > { %640 = dma.done.wait (%p507_p6), %s381_s20, 512  }
 0x159   : > { %642 = vsyncadd (%p507_p6), %s381_s20, 4294966784  ;;  %s18_s14 = sadd.s32 1, %s665_s14   ;;  %s851_s9 = smov %s649_s10 }
 0x15a   : > { %p15_p7 = scmp.ge.s32.totalorder %s18_s14, 10   ;;  %s852_s10 = smov %s653_s11 }
 0x15b   : > { %s853_s11 = smov %s748_s23  ;;  %s854_s12 = smov %s661_s13 }
 0x15c   : > { %s855_s13 = smov %s857_s17  ;;  %17 = sbr.rel (!%p15_p7) target bundleno = 6 (0x6), region = 82 }
 0x161   :  { %387 = vsyncpa [#allocation3], 1 }
 0x162   :  { %389 = vsyncpa [#allocation3 + $0x1], 1 }
 0x163   :  { %390 = vsyncpa [#allocation4], 1 }
 0x164   :  { %392 = vsyncpa [#allocation4 + $0x1], 1 }

// kernel: tpu_custom_call.1
= control target key start
LH: loop header
LB: loop body
LE: loop exit
PB: predicated region body
PF: predicated region fallthrough
CT: control target
= control target key end

     0   :  { %7 = vsyncpa [#allocation3], 0  ;;  %s847_s0 = inlined_call_operand.vmem [shape: f32[8,1,2], index: 0, kind: input, shape index: {}]   ;;  %s848_s1 = inlined_call_operand.hbm [shape: f32[8,2,16], index: 1, kind: input, shape index: {}]   ;;  %s849_s2 = inlined_call_operand.hbm [shape: f32[8,2,256], index: 2, kind: output, shape index: {}]  }
   0x1   :  { %9 = vsyncpa [#allocation3 + $0x1], 0 }
   0x2   :  { %10 = vsyncpa [#allocation4], 0 }
   0x3   :  { %12 = vsyncpa [#allocation4 + $0x1], 0  ;;  %s718_s9 = smov 0   ;;  %s720_s10 = smov 0  }
   0x4   :  { %s722_s11 = smov 0   ;;  %s724_s12 = smov 0  }
   0x5   :  { %s726_s13 = smov 0   ;;  %s728_s14 = smov 0  }
   0x6 LB: > { %s474_s15 = sadd.s32 4294967295, %s697_s14   ;;  %s475_s16 = sadd.s32 4294967294, %s697_s14   ;;  %s697_s14 = sphi %s728_s14, %s18_s14   ;;  %s693_s13 = sphi %s726_s13, %s858_s13   ;;  %s689_s12 = sphi %s724_s12, %s857_s12   ;;  %s685_s11 = sphi %s722_s11, %s856_s11   ;;  %s681_s10 = sphi %s720_s10, %s855_s10   ;;  %s677_s9 = sphi %s718_s9, %s854_s9  }
   0x7   : > { %s30_s17 = sadd.s32 1, %s693_s13  ;;  %s63_s18 = sadd.s32 1, %s685_s11 }
   0x8   : > { %p32_p0 = scmp.ge.s32.totalorder %s30_s17, 8  ;;  %p70_p1 = scmp.ne.s32.totalorder %s685_s11, %s681_s10 }
   0x9   : > { %p71_p2 = scmp.eq.s32.totalorder %s697_s14, 0  ;;  %p76_p3 = scmp.ne.s32.totalorder %s681_s10, %s677_s9 }
   0xa   : > { %s860_s17 = smov (%p32_p0, %s30_s17), 0  ;;  %p77_p5 = scmp.eq.s32.totalorder %s474_s15, 0 }
   0xb   : > { %p759_p4 = por %p71_p2, %p70_p1  ;;  %s60_s20 = ssub.s32 %s693_s13, %s860_s17 }
   0xc   : > { %p102_p6 = scmp.eq.s32.totalorder %s474_s15, 7  ;;  %p61_p7 = scmp.eq.s32.totalorder %s60_s20, 0 }
   0xd   : > { %p765_p8 = por %p77_p5, %p76_p3  ;;  %p108_p10 = scmp.eq.s32.totalorder %s475_s16, 7 }
   0xe   : > { %p769_p9 = por %p102_p6, %p70_p1  ;;  %p527_p12 = scmp.lt.s32.totalorder %s697_s14, 8 }
   0xf   : > { %s774_s23 = scalar_select %p61_p7, %s685_s11, %s63_s18  }
  0x10   : > { %p776_p11 = por %p108_p10, %p76_p3  ;;  %s134_s25 = sand.u32 1, %s685_s11  }
  0x11   : > { %s478_s26 = sshll.u32 %s134_s25, 1  ;;  %s479_s27 = sshll.u32 %s693_s13, 1 }
  0x12   : > { %s142_s30 = scalar_lea.hbm %s848_s1, %s479_s27  ;;  %s138_s3 = scalar_lea.vmem [#allocation2], %s478_s26 }
  0x13   : > { %s146_s4 = sshll.u32 %s138_s3, 4  ;;  %s144_s5 = sshll.u32 %s142_s30, 4  ;;  %s147_s4 = int_to_ptr.vmem [resolvable:$true] %s146_s4  ;;  %s145_s5 = int_to_ptr.hbm [resolvable:$true] %s144_s5 }
  0x14   : > { %p520_p13 = pnand %p527_p12, %p759_p4  ;;  %p480_p0 = scmp.ge.s32.totalorder %s697_s14, 1 }
  0x15   : > { %p151_p1 = scmp.lt.s32.totalorder %s697_s14, 9  ;;  %s135_s6 = scalar_lea.sflag [#allocation3], %s134_s25 }
  0x16   : > { %522 = dma.hbm_to_vmem [thread:$0]  (!%p520_p13), %s145_s5, 32, %s147_s4, %s135_s6  }
  0x17   : > { %p152_p2 = pnand %p480_p0, %p151_p1 }
  0x18   : > { %s791_s7 = sand.u32 (!%p152_p2), 1, %s681_s10  }
  0x19   : > { %155 = sbr.rel (%p152_p2) target bundleno = 325 (0x145), region = 28  ;;  %s481_s8 = sshll.u32 (!%p152_p2), %s791_s7, 1 }
  0x1a   : > { %s158_s15 = scalar_lea.sflag (!%p152_p2), [#allocation3], %s791_s7  ;;  %s795_s16 = scalar_lea.vmem (!%p152_p2), [#allocation2], %s481_s8 }
  0x1e   : > { %668 = dma.done.wait (%p765_p8), %s158_s15, 32  }
  0x1f   : > { %670 = vsyncadd (%p765_p8), %s158_s15, 4294967264  ;;  %p186_p3 = scmp.lt.s32.totalorder %s689_s12, 7  ;;  %v699_v0 = vmov 0   ;;  %v700_v2 = vmov 1   ;;  %v701_v3 = vmov 16.0   ;;  %v192_v6 = vlaneseq  ;;  %s482_s21 = sshll.u32 %s791_s7, 2 }
  0x20   : > { %581 = vset.pattern.permute.xlu0 %v699_v0  ;;  %583 = vrcp.f32 %v701_v3  ;;  %s506_s26 = sshll.u32 %s689_s12, 2  ;;  %s185_s30 = scalar_lea.vmem [#allocation5], %s482_s21 }
  0x21   : > { %s187_s18 = scalar_select %p186_p3, %s689_s12, 7  ;;  %v193_v8 = vand.u32 127, %v192_v6 }
  0x22   : > { %s379_s29 = scalar_lea.hbm %s849_s2, %s506_s26  ;;  %s381_s3 = sshll.u32 %s185_s30, 4  ;;  %s382_s3 = int_to_ptr.vmem [resolvable:$true] %s381_s3 }
  0x23   : > { %s188_s25 = scalar_lea.vmem %s847_s0, %s187_s18  ;;  %v194_v10 = vadd.s32 128, %v193_v8  ;;  %v198_v12 = vcvt.s32.f32 %v193_v8  ;;  %s383_s4 = sshll.u32 %s379_s29, 4  ;;  %s384_s4 = int_to_ptr.hbm [resolvable:$true] %s383_s4 }
  0x24   : > { %v190_v1 = vld [vmem:[%s188_s25] sm:$0x1]  ;;  %s366_s5 = scalar_lea.sflag [#allocation4], %s791_s7  ;;  %s629_s6 = sshra.s32 %s384_s4, 4  ;;  %s630_s6 = int_to_ptr.hbm [resolvable:$true] %s629_s6 }
  0x25   : > { %233 = vperm.xlu0 %581, %v190_v1   ;;  %v199_v13 = vcvt.s32.f32 %v194_v10  ;;  %s631_s12 = scalar_lea.hbm %s630_s6, 4  ;;  %p636_p7 = scmp.lt.s32.totalorder %s630_s6, %s849_s2 }
  0x26   : > { %v584_v4 = vpop.eup %583  ;;  %p632_p4 = scmp.ne.s32.totalorder %s630_s6, %s631_s12 }
  0x27   : > { %v201_v5 = vmul.f32 16.0, %v584_v4  ;;  %vm205_vm0 = vweird.f32 %v584_v4 }
  0x28   : > { %p633_p5 = pnand %p632_p4, %p769_p9 }
  0x29   : > { %v202_v7 = vsub.f32 1.0, %v201_v5 }
  0x2a   : > { %p634_p6 = pneg %p633_p5 }
  0x2b   : > { %v203_v9 = vmul.f32 %v584_v4, %v202_v7 }
  0x2d   : > { %582 = vset.pattern.permute.xlu0 %v700_v2  ;;  %v204_v11 = vadd.f32 %v584_v4, %v203_v9 }
  0x2e   : > { %240 = vperm.xlu0 %582, %v190_v1  }
  0x2f   : > { %v206_v14 = vsel %vm205_vm0, %v584_v4, %v204_v11 }
  0x30   : > { %v207_v15 = vmul.f32 %v206_v14, %v198_v12  ;;  %v208_v16 = vmul.f32 %v206_v14, %v199_v13 }
  0x32   : > { %v209_v17 = vfloor.f32 %v207_v15  ;;  %v210_v18 = vfloor.f32 %v208_v16  ;;  %v299_v16 = vshrl.u32 %v192_v6, 7  ;;  %v702_v6 = vmov 1.0  }
  0x34   : > { %v211_v19 = vmul.f32 16.0, %v209_v17  ;;  %v212_v20 = vmul.f32 16.0, %v210_v18  ;;  %v223_v23 = vmul.f32 2.0, %v209_v17  ;;  %v224_v26 = vmul.f32 2.0, %v210_v18 }
  0x36   : > { %v213_v21 = vsub.f32 %v198_v12, %v211_v19  ;;  %v214_v22 = vsub.f32 %v199_v13, %v212_v20  ;;  %v225_v27 = vadd.f32 1.0, %v223_v23  ;;  %v226_v30 = vadd.f32 1.0, %v224_v26 }
  0x38   : > { %v215_v24 = vmul.f32 2.0, %v213_v21  ;;  %v216_v25 = vmul.f32 2.0, %v214_v22  ;;  %v227_v32 = vmul.f32 %v225_v27, %v206_v14  ;;  %v228_v35 = vmul.f32 %v226_v30, %v206_v14 }
  0x39   : > { %v300_v21 = vadd.s32 8, %v299_v16 }
  0x3a   : > { %v217_v28 = vadd.f32 1.0, %v215_v24  ;;  %v218_v29 = vadd.f32 1.0, %v216_v25  ;;  %v485_v36 = vadd.f32 -1.0, %v227_v32  ;;  %v486_v39 = vadd.f32 -1.0, %v228_v35  ;;  %v313_v24 = vld [vmem:[%s795_s16] sm:$0x3] }
  0x3b   : > { %s635_s16 = scalar_lea.hbm %s849_s2, 32 }
  0x3c   : > { %v219_v33 = vmul.f32 %v217_v28, %v206_v14  ;;  %v220_v34 = vmul.f32 %v218_v29, %v206_v14  ;;  %p637_p8 = scmp.lt.s32.totalorder %s635_s16, %s631_s12 }
  0x3e   : > { %v483_v37 = vadd.f32 -1.0, %v219_v33  ;;  %v484_v38 = vadd.f32 -1.0, %v220_v34  ;;  %p638_p10 = por %p637_p8, %p636_p7 }
  0x40   : > { %p639_p12 = pnand %p638_p10, %p634_p6 }
  0x97   : > { %v234_v31 = vpop.permute.xlu0 %233 }
  0x98   : > { %v236_v40 = vperm.slane %v234_v31, 0 }
  0x9a   : > { %v237_v43 = vmul.f32 %v483_v37, %v236_v40  ;;  %v238_v44 = vmul.f32 %v484_v38, %v236_v40  ;;  %v250_v45 = vmul.f32 %v485_v36, %v236_v40  ;;  %v251_v46 = vmul.f32 %v486_v39, %v236_v40 }
  0xa0   : > { %v241_v41 = vpop.permute.xlu0 %240 }
  0xa1   : > { %v243_v42 = vperm.slane %v241_v41, 0 }
  0xa3   : > { %v244_v47 = vmul.f32 %v485_v36, %v243_v42  ;;  %v245_v48 = vmul.f32 %v486_v39, %v243_v42  ;;  %v248_v49 = vmul.f32 %v483_v37, %v243_v42  ;;  %v249_v50 = vmul.f32 %v484_v38, %v243_v42 }
  0xa5   : > { %v246_v51 = vadd.f32 %v244_v47, %v237_v43  ;;  %v247_v52 = vadd.f32 %v245_v48, %v238_v44  ;;  %v252_v53 = vsub.f32 %v248_v49, %v250_v45  ;;  %v253_v54 = vsub.f32 %v249_v50, %v251_v46 }
  0xa7   : > { %v254_v55 = vadd.f32 1.0, %v246_v51  ;;  %v255_v56 = vadd.f32 1.0, %v247_v52  ;;  %v262_v57 = vadd.f32 1.0, %v252_v53  ;;  %v263_v58 = vadd.f32 1.0, %v253_v54 }
  0xa9   : > { %v256_v59 = vmul.f32 16.0, %v254_v55  ;;  %v264_v60 = vmul.f32 16.0, %v262_v57  ;;  %v257_v61 = vmul.f32 16.0, %v255_v56  ;;  %v265_v62 = vmul.f32 16.0, %v263_v58 }
  0xab   : > { %v487_v63 = vadd.f32 -1.0, %v256_v59  ;;  %v489_v0 = vadd.f32 -1.0, %v264_v60  ;;  %v488_v1 = vadd.f32 -1.0, %v257_v61  ;;  %v490_v2 = vadd.f32 -1.0, %v265_v62 }
  0xad   : > { %v260_v3 = vmul.f32 0.5, %v487_v63  ;;  %v268_v4 = vmul.f32 0.5, %v489_v0  ;;  %v261_v5 = vmul.f32 0.5, %v488_v1  ;;  %v269_v7 = vmul.f32 0.5, %v490_v2 }
  0xaf   : > { %v270_v8 = vadd.f32 0.5, %v260_v3  ;;  %v276_v9 = vadd.f32 0.5, %v268_v4  ;;  %v271_v10 = vadd.f32 0.5, %v261_v5  ;;  %v277_v11 = vadd.f32 0.5, %v269_v7 }
  0xb1   : > { %v272_v12 = vfloor.f32 %v270_v8  ;;  %v278_v13 = vfloor.f32 %v276_v9  ;;  %v273_v14 = vfloor.f32 %v271_v10  ;;  %v279_v15 = vfloor.f32 %v277_v11 }
  0xb3   : > { %v508_v17 = vcvt.f32.s32 %v272_v12  ;;  %v512_v18 = vcvt.f32.s32 %v278_v13  ;;  %v510_v19 = vcvt.f32.s32 %v273_v14  ;;  %v514_v20 = vcvt.f32.s32 %v279_v15 }
  0xb5   : > { %vm282_vm1 = vcmp.ge.s32.totalorder %v508_v17, 0  ;;  %vm284_vm2 = vcmp.lt.s32.totalorder %v508_v17, 16  ;;  %vm288_vm3 = vcmp.ge.s32.totalorder %v512_v18, 0  ;;  %vm283_vm5 = vcmp.ge.s32.totalorder %v510_v19, 0 }
  0xb6   : > { %vm286_vm4 = vmand %vm282_vm1, %vm284_vm2  ;;  %vm285_vm6 = vcmp.lt.s32.totalorder %v510_v19, 16  ;;  %vm292_vm8 = vcmp.lt.s32.totalorder %v512_v18, 16  ;;  %vm289_vm9 = vcmp.ge.s32.totalorder %v514_v20, 0  ;;  %vm293_vm14 = vcmp.lt.s32.totalorder %v514_v20, 16 }
  0xb7   : > { %vm290_vm7 = vmand %vm286_vm4, %vm288_vm3  ;;  %vm314_vm2 = vcmask 130048   ;;  %vm361_vm4 = vcmask 1041408  }
  0xb8   : > { %vm294_vm10 = vmand %vm290_vm7, %vm292_vm8 }
  0xb9   : > { %v296_v22 = vsel %vm294_vm10, %v512_v18, 4294967295  ;;  %vm287_vm11 = vmand %vm283_vm5, %vm285_vm6 }
  0xba   : > { %vm303_vm12 = vcmp.eq.s32.totalorder %v300_v21, %v296_v22  ;;  %vm291_vm13 = vmand %vm287_vm11, %vm289_vm9  ;;  %vm301_vm0 = vcmp.eq.s32.totalorder %v299_v16, %v296_v22 }
  0xbb   : > { %495 = vmatpush.msk.msra.mxu0 %vm303_vm12, %v702_v6  ;;  %vm295_vm15 = vmand %vm291_vm13, %vm293_vm14 }
  0xbc   : > { %v297_v23 = vsel %vm295_vm15, %v514_v20, 4294967295 }
  0xbd   : > { %vm304_vm1 = vcmp.eq.s32.totalorder %v300_v21, %v297_v23  ;;  %496 = vmatpush.msk.msra.mxu0 %vm301_vm0, %v702_v6  ;;  %vm302_vm3 = vcmp.eq.s32.totalorder %v299_v16, %v297_v23 }
  0xbe   : > { %498 = vmatpush.msk.msra.mxu1 %vm304_vm1, %v702_v6  ;;  %497 = vmatmul.msk.f32.vlgmr.msra.gmra.mxu0 %vm314_vm2, %v313_v24 }
  0xc0   : > { %499 = vmatpush.msk.msra.mxu1 %vm302_vm3, %v702_v6 }
  0xc1   : > { %500 = vmatmul.msk.f32.vlgmr.msra.gmra.mxu1 %vm314_vm2, %v313_v24 }
 0x13b   : > { %v335_v26 = vpop.f32.mrf.mxu0 }
 0x13e   : > { %v355_v25 = vpop.f32.mrf.mxu1 }
 0x13f   : > { %v360_v27 = vrot.slane %v355_v25, 6 }
 0x141   : > { %v362_v28 = vsel %vm361_vm4, %v335_v26, %v360_v27 }
 0x142   : > { %364 = vst [vmem:[%s185_s30] sm:$0xf] %v362_v28 }
 0x143   : > { %642 = shalt.err (!%p639_p12)
}
 0x144   : > { %517 = dma.vmem_to_hbm [thread:$0]  (%p769_p9), %s382_s3, 64, %s384_s4, %s366_s5  }
 0x145 PF: > { %p528_p13 = scmp.ge.s32.totalorder %s697_s14, 2  ;;  %s395_s7 = sand.u32 1, %s677_s9  }
 0x146   : > { %s396_s20 = scalar_lea.sflag [#allocation4], %s395_s7 }
 0x147   : > { %p524_p0 = pnand %p528_p13, %p776_p11 }
 0x149   : > { %p525_p1 = pneg %p524_p0 }
 0x14b   : > { %672 = dma.done.wait (%p525_p1), %s396_s20, 64  }
 0x14c   : > { %674 = vsyncadd (%p525_p1), %s396_s20, 4294967232  ;;  %s18_s14 = sadd.s32 1, %s697_s14   ;;  %s854_s9 = smov %s681_s10 }
 0x14d   : > { %p15_p2 = scmp.ge.s32.totalorder %s18_s14, 10   ;;  %s855_s10 = smov %s685_s11 }
 0x14e   : > { %s856_s11 = smov %s774_s23  ;;  %s857_s12 = smov %s693_s13 }
 0x14f   : > { %s858_s13 = smov %s860_s17  ;;  %17 = sbr.rel (!%p15_p2) target bundleno = 6 (0x6), region = 76 }
 0x154   :  { %402 = vsyncpa [#allocation3], 1 }
 0x155   :  { %404 = vsyncpa [#allocation3 + $0x1], 1 }
 0x156   :  { %405 = vsyncpa [#allocation4], 1 }
 0x157   :  { %407 = vsyncpa [#allocation4 + $0x1], 1 }

</bundles_post_ra>
